<compile_context>
chip_gen: v7x
topology: tpu7x:2x2x1
jax: 0.10.0
libtpu: 0.0.40
codegen_flags: <defaults>
</compile_context>

<pallas_src>
import jax
import jax.numpy as jnp
from jax.experimental import pallas as pl
from jax.experimental.pallas import tpu as pltpu


# ----------------------------------------------------------------------------
# Grid-less kernel: whole problem in VMEM (small / demo batches).
# ----------------------------------------------------------------------------
def muscall_small_kernel(scale_ref,      # SMEM (1,)   f32 : logit scale (1/temperature)
                         audio_ref,      # VMEM (B,Da) bf16: audio backbone output (padded)
                         text_ref,       # VMEM (B,Dt) bf16: pooled text backbone output (padded)
                         wa_ref,         # VMEM (Da,P) bf16: audio_projection weight (x @ W)
                         wt_ref,         # VMEM (Dt,P) bf16: text_projection weight  (x @ W)
                         loss_ref,       # VMEM (1,1)  f32 out
                         logits_ref):    # VMEM (B,B)  f32 out: logits_per_audio
    # Projection heads (nn.Linear, bias=False): bf16 operands, f32 MXU accumulation.
    af = jax.lax.dot_general(audio_ref[...], wa_ref[...],
                             dimension_numbers=(((1,), (0,)), ((), ())),
                             preferred_element_type=jnp.float32)
    tf = jax.lax.dot_general(text_ref[...], wt_ref[...],
                             dimension_numbers=(((1,), (0,)), ((), ())),
                             preferred_element_type=jnp.float32)

    # L2 normalization along the feature dim (f32, VPU + EUP rsqrt).
    af = af * jax.lax.rsqrt(jnp.sum(af * af, axis=-1, keepdims=True))
    tf = tf * jax.lax.rsqrt(jnp.sum(tf * tf, axis=-1, keepdims=True))

    # Fold the logit scale once into the (B,P) audio features instead of
    # scaling two (B,B) matrices afterwards.
    af_s = af * scale_ref[0]

    # Correct-pair logits (softmax diagonal), shared by both loss terms (pre-scaled).
    diag = jnp.sum(af_s * tf, axis=-1, keepdims=True)                     # (B,1)

    # Single similarity matmul, contracting the last dims of both operands.
    logits_per_audio = jax.lax.dot_general(
        af_s.astype(jnp.bfloat16), tf.astype(jnp.bfloat16),
        dimension_numbers=(((1,), (1,)), ((), ())),
        preferred_element_type=jnp.float32)                               # (B,B)
    # Exact transpose (one XLU transpose) instead of a second BxBxP MXU matmul.
    logits_per_text = logits_per_audio.T

    def _lse(lg):                                                         # (B,1), stays 2D
        m = jnp.max(lg, axis=-1, keepdims=True)
        return m + jnp.log(jnp.sum(jnp.exp(lg - m), axis=-1, keepdims=True))

    audio_loss = jnp.mean(_lse(logits_per_audio) - diag)
    text_loss = jnp.mean(_lse(logits_per_text) - diag)
    # TODO(synk): type_loss='weighted_clip' (sentence_sim weighting) not implemented;
    # this kernel implements type_loss='clip'.
    loss_ref[...] = jnp.reshape(0.5 * (audio_loss + text_loss), (1, 1))
    logits_ref[...] = logits_per_audio


# ----------------------------------------------------------------------------
# Row-tiled kernel: grid over audio row tiles (production batch sizes).
# Text features are projected/normalized once and kept resident in VMEM scratch;
# audio row tiles are streamed; column-direction LSE is accumulated online.
# ----------------------------------------------------------------------------
def muscall_tiled_kernel(scale_ref,      # SMEM (1,)    f32
                         audio_ref,      # VMEM (tm,Da) bf16 : audio row tile
                         text_ref,       # VMEM (B,Dt)  bf16 : pooled text feats (resident)
                         wa_ref,         # VMEM (Da,P)  bf16 : resident
                         wt_ref,         # VMEM (Dt,P)  bf16 : resident
                         loss_ref,       # VMEM (1,1)   f32 out (resident accumulator)
                         logits_ref,     # VMEM (tm,B)  f32 out: logits_per_audio row tile
                         tf_scr,         # VMEM (B,P)   bf16 scratch: normalized text feats
                         col_m,          # VMEM (1,B)   f32 scratch: running column max
                         col_l,          # VMEM (1,B)   f32 scratch: running column sum-exp
                         row_acc,        # VMEM (1,1)   f32 scratch: sum of row LSE
                         diag_acc):      # VMEM (1,1)   f32 scratch: sum of diagonal
    i = pl.program_id(0)
    tm = audio_ref.shape[0]
    n_cols = logits_ref.shape[1]          # == total batch B

    @pl.when(i == 0)
    def _():
        # Project + normalize ALL text features once; keep them resident (bf16).
        tf = jax.lax.dot_general(text_ref[...], wt_ref[...],
                                 dimension_numbers=(((1,), (0,)), ((), ())),
                                 preferred_element_type=jnp.float32)
        tf = tf * jax.lax.rsqrt(jnp.sum(tf * tf, axis=-1, keepdims=True))
        tf_scr[...] = tf.astype(jnp.bfloat16)
        col_m[...] = jnp.full_like(col_m, -jnp.inf)
        col_l[...] = jnp.zeros_like(col_l)
        row_acc[...] = jnp.zeros_like(row_acc)
        diag_acc[...] = jnp.zeros_like(diag_acc)

    # Project + normalize this audio row tile; fold in the logit scale.
    af = jax.lax.dot_general(audio_ref[...], wa_ref[...],
                             dimension_numbers=(((1,), (0,)), ((), ())),
                             preferred_element_type=jnp.float32)
    af = af * jax.lax.rsqrt(jnp.sum(af * af, axis=-1, keepdims=True))
    af_s = af * scale_ref[0]

    # Logits tile: contract last dims of both operands (no transpose of tf).
    logits = jax.lax.dot_general(af_s.astype(jnp.bfloat16), tf_scr[...],
                                 dimension_numbers=(((1,), (1,)), ((), ())),
                                 preferred_element_type=jnp.float32)      # (tm, B)
    logits_ref[...] = logits

    # Correct-pair logits for this tile: global rows [i*tm, i*tm + tm).
    row0 = pl.multiple_of(i * tm, 8)
    tf_blk = tf_scr[pl.ds(row0, tm), :].astype(jnp.float32)               # (tm, P)
    diag_acc[...] += jnp.sum(af_s * tf_blk)

    # Row-direction (audio loss) log-sum-exp, lane-wise.
    m = jnp.max(logits, axis=-1, keepdims=True)
    row_lse = m + jnp.log(jnp.sum(jnp.exp(logits - m), axis=-1, keepdims=True))
    row_acc[...] += jnp.sum(row_lse)

    # Column-direction (text loss) log-sum-exp, accumulated online across row tiles.
    cm_new = jnp.maximum(col_m[...], jnp.max(logits, axis=0, keepdims=True))   # (1,B)
    col_l[...] = (col_l[...] * jnp.exp(col_m[...] - cm_new)
                  + jnp.sum(jnp.exp(logits - cm_new), axis=0, keepdims=True))
    col_m[...] = cm_new

    @pl.when(i == pl.num_programs(0) - 1)
    def _():
        inv_b = 1.0 / n_cols
        col_lse_sum = jnp.sum(col_m[...] + jnp.log(col_l[...]))
        audio_loss = (row_acc[...] - diag_acc[...]) * inv_b               # (1,1)
        text_loss = (col_lse_sum - diag_acc[...]) * inv_b                 # (1,1)
        # TODO(synk): type_loss='weighted_clip' not implemented (clip loss only).
        loss_ref[...] = 0.5 * (audio_loss + text_loss)


# ----------------------------------------------------------------------------
# Wrapper
# ----------------------------------------------------------------------------
def _pad_last_to(x, mult):
    pad = (-x.shape[-1]) % mult
    if pad:
        x = jnp.pad(x, [(0, 0)] * (x.ndim - 1) + [(0, pad)])
    return x


def muscall_forward(audio_backbone_feats, text_token_feats, text_tokens,
                    w_audio_proj, w_text_proj, temperature, *, block_rows=None):
    """Pooled-token gather (CLIP EOT convention) + Pallas kernel call."""
    B = audio_backbone_feats.shape[0]
    if B % 8 != 0:
        # TODO(synk): support ragged B by masking padded rows in LSE/diag/mean.
        raise ValueError("batch size must be a multiple of 8")

    # encode_text pooling: text_features[arange(B), text.argmax(dim=-1)].
    # TODO(synk): fuse this gather into the kernel with PrefetchScalarGridSpec +
    # a pl.Element row-gather on the token axis.
    pool_idx = jnp.argmax(text_tokens, axis=-1)
    text_pooled = text_token_feats[jnp.arange(B), pool_idx]               # [B, text_dim]

    # bf16 inputs: halves HBM->VMEM DMA bytes and VMEM footprint of the four
    # large operands; all matmuls accumulate in f32.  Zero padding of the
    # feature dims to lane multiples is exact for the matmuls / norm / logits.
    a = _pad_last_to(audio_backbone_feats.astype(jnp.bfloat16), 128)       # [B, Da_pad]
    t = _pad_last_to(text_pooled.astype(jnp.bfloat16), 128)                # [B, Dt_pad]
    wa = _pad_last_to(w_audio_proj.astype(jnp.bfloat16), 128)              # [Da, P_pad]
    wt = _pad_last_to(w_text_proj.astype(jnp.bfloat16), 128)               # [Dt, P_pad]
    wa = jnp.pad(wa, ((0, a.shape[1] - wa.shape[0]), (0, 0)))              # [Da_pad, P_pad]
    wt = jnp.pad(wt, ((0, t.shape[1] - wt.shape[0]), (0, 0)))              # [Dt_pad, P_pad]

    scale = jnp.asarray([1.0 / temperature], dtype=jnp.float32)

    # VMEM limit derived from actual operand sizes (not hard-coded); clamped to
    # a range that is safe on every generation (v7x VMEM is 64 MiB).
    io_bytes = sum(int(x.size) * x.dtype.itemsize for x in (a, t, wa, wt)) + B * B * 4
    vmem_limit = int(min(max(2 * io_bytes + (8 << 20), 32 << 20), 64 << 20))

    out_shapes = (
        jax.ShapeDtypeStruct((1, 1), jnp.float32),   # loss
        jax.ShapeDtypeStruct((B, B), jnp.float32),   # logits_per_audio
    )
    vmem = pl.BlockSpec(memory_space=pltpu.MemorySpace.VMEM)
    smem = pl.BlockSpec(memory_space=pltpu.MemorySpace.SMEM)

    if block_rows is None:
        # Small/demo batches: single shot (per-step grid overhead would dominate).
        # Production batches: 256-row tiles (fills v6e/v7x 256-wide MXU).
        block_rows = B if B <= 256 else 256

    if block_rows >= B:
        loss, logits_audio = pl.pallas_call(
            muscall_small_kernel,
            out_shape=out_shapes,
            in_specs=[smem, vmem, vmem, vmem, vmem],
            out_specs=(vmem, vmem),
            compiler_params=pltpu.CompilerParams(vmem_limit_bytes=vmem_limit),
        )(scale, a, t, wa, wt)
    else:
        tm = block_rows
        if B % tm != 0 or tm % 8 != 0:
            raise ValueError("block_rows must divide B and be a multiple of 8")
        Da, Dt, P = a.shape[1], t.shape[1], wa.shape[1]
        grid_spec = pltpu.PrefetchScalarGridSpec(
            num_scalar_prefetch=0,
            grid=(B // tm,),
            in_specs=[
                smem,                                               # scale
                pl.BlockSpec((tm, Da), lambda i: (i, 0)),           # audio row tile (streamed)
                pl.BlockSpec((B, Dt), lambda i: (0, 0)),            # pooled text (resident)
                pl.BlockSpec((Da, P), lambda i: (0, 0)),            # W_audio (resident)
                pl.BlockSpec((Dt, P), lambda i: (0, 0)),            # W_text (resident)
            ],
            out_specs=(
                pl.BlockSpec((1, 1), lambda i: (0, 0)),             # loss (resident accumulator)
                pl.BlockSpec((tm, B), lambda i: (i, 0)),            # logits_per_audio row tile
            ),
            scratch_shapes=[
                pltpu.VMEM((B, P), jnp.bfloat16),    # normalized text features
                pltpu.VMEM((1, B), jnp.float32),     # running column max
                pltpu.VMEM((1, B), jnp.float32),     # running column sum-exp
                pltpu.VMEM((1, 1), jnp.float32),     # sum of row LSE
                pltpu.VMEM((1, 1), jnp.float32),     # sum of diagonal
            ],
        )
        loss, logits_audio = pl.pallas_call(
            muscall_tiled_kernel,
            out_shape=out_shapes,
            grid_spec=grid_spec,
            # The column-LSE accumulators carry across row tiles -> "arbitrary".
            # TODO(synk): for v7x megacore, give each TensorCore private column
            # accumulators over a leading "parallel" axis and merge at the end.
            compiler_params=pltpu.CompilerParams(
                dimension_semantics=("arbitrary",),
                vmem_limit_bytes=vmem_limit),
        )(scale, a, t, wa, wt)

    # logits_per_text is exactly the transpose of logits_per_audio (matches the
    # PyTorch reference) -> no second matmul, no second B^2 HBM writeback.
    logits_text = logits_audio.T
    return loss[0, 0], logits_audio, logits_text


# ----------------------------------------------------------------------------
# Pure-JAX reference (mirrors the PyTorch module, type_loss='clip')
# ----------------------------------------------------------------------------
def _reference(audio_backbone_feats, text_token_feats, text_tokens,
               w_audio_proj, w_text_proj, temperature):
    B = audio_backbone_feats.shape[0]
    pool_idx = jnp.argmax(text_tokens, axis=-1)
    text_pooled = text_token_feats[jnp.arange(B), pool_idx]
    af = audio_backbone_feats @ w_audio_proj
    tf = text_pooled @ w_text_proj
    af = af / jnp.linalg.norm(af, axis=-1, keepdims=True)
    tf = tf / jnp.linalg.norm(tf, axis=-1, keepdims=True)
    logits_per_audio = (1.0 / temperature) * af @ tf.T
    logits_per_text = logits_per_audio.T

    def ce(lg):
        lse = jax.nn.logsumexp(lg, axis=-1)
        return jnp.mean(lse - jnp.diagonal(lg))

    loss = 0.5 * (ce(logits_per_text) + ce(logits_per_text.T))
    return loss, logits_per_audio, logits_per_text


if __name__ == "__main__":
    AUDIO_DIM = 64   # audio_config.hidden_size (wrapper pads to 128)
    TEXT_DIM = 96    # text_config.hidden_size  (wrapper pads to 128)
    PROJ_DIM = 128   # config.projection_dim    (already lane-dense)
    SEQ = 8          # text sequence length
    TEMPERATURE = 0.07

    def make_inputs(key, batch):
        k1, k2, k3, k4, k5 = jax.random.split(key, 5)
        # Stand-ins for backbone outputs (ModifiedResNet / TextTransformer not provided).
        audio_feats = jax.random.normal(k1, (batch, AUDIO_DIM), dtype=jnp.float32)
        text_feats = jax.random.normal(k2, (batch, SEQ, TEXT_DIM), dtype=jnp.float32)
        tokens = jax.random.randint(k3, (batch, SEQ), 0, 100, dtype=jnp.int32)
        # Projection weights stored as [in_dim, proj_dim] so x @ W == nn.Linear(bias=False).
        w_a = (jax.random.normal(k4, (AUDIO_DIM, PROJ_DIM), dtype=jnp.float32)
               / jnp.sqrt(AUDIO_DIM))
        w_t = (jax.random.normal(k5, (TEXT_DIM, PROJ_DIM), dtype=jnp.float32)
               / jnp.sqrt(TEXT_DIM))
        return audio_feats, text_feats, tokens, w_a, w_t

    # 1) Small single-shot (grid-less) path, B=8.
    args = make_inputs(jax.random.PRNGKey(0), 8)
    loss, logits_a, logits_t = muscall_forward(*args, TEMPERATURE)
    jax.block_until_ready((loss, logits_a, logits_t))
    ref_loss, ref_la, ref_lt = _reference(*args, TEMPERATURE)
    assert jnp.allclose(loss, ref_loss, atol=5e-2, rtol=5e-2), (loss, ref_loss)
    assert jnp.allclose(logits_a, ref_la, atol=1e-1, rtol=5e-2)
    assert jnp.allclose(logits_t, ref_lt, atol=1e-1, rtol=5e-2)

    # 2) Row-tiled gridded path (same math as the production configuration,
    #    exercised at small shapes: B=32, 8-row tiles -> 4 grid steps).
    args2 = make_inputs(jax.random.PRNGKey(0), 32)
    loss2, logits_a2, logits_t2 = muscall_forward(*args2, TEMPERATURE, block_rows=8)
    jax.block_until_ready((loss2, logits_a2, logits_t2))
    ref_loss2, ref_la2, ref_lt2 = _reference(*args2, TEMPERATURE)
    assert jnp.allclose(loss2, ref_loss2, atol=5e-2, rtol=5e-2), (loss2, ref_loss2)
    assert jnp.allclose(logits_a2, ref_la2, atol=1e-1, rtol=5e-2)
    assert jnp.allclose(logits_t2, ref_lt2, atol=1e-1, rtol=5e-2)

    print("KERNEL_OK")
</pallas_src>

<mosaic_0001>
module attributes {stable_mosaic.version = 11 : i64} {
  func.func @muscall_small_kernel(%arg0: memref<1xf32, #tpu.memory_space<smem>>, %arg1: memref<8x128xbf16, #tpu.memory_space<vmem>>, %arg2: memref<8x128xbf16, #tpu.memory_space<vmem>>, %arg3: memref<128x128xbf16, #tpu.memory_space<vmem>>, %arg4: memref<128x128xbf16, #tpu.memory_space<vmem>>, %arg5: memref<1x1xf32, #tpu.memory_space<vmem>>, %arg6: memref<8x8xf32, #tpu.memory_space<vmem>>) attributes {dimension_semantics = [], scalar_prefetch = 0 : i64, scratch_operands = 0 : i64, tpu.core_type = #tpu.core_type<tc>} {
    %c0 = arith.constant 0 : index
    %c0_0 = arith.constant 0 : index
    %0 = vector.load %arg1[%c0, %c0_0] : memref<8x128xbf16, #tpu.memory_space<vmem>>, vector<8x128xbf16>
    %c0_1 = arith.constant 0 : index
    %c0_2 = arith.constant 0 : index
    %1 = vector.load %arg3[%c0_1, %c0_2] : memref<128x128xbf16, #tpu.memory_space<vmem>>, vector<128x128xbf16>
    %cst = arith.constant dense<0.000000e+00> : vector<8x128xf32>
    %2 = tpu.matmul %0, %1, %cst {dimension_numbers = #tpu.dot_dimension_numbers<[1], [0], [0], [1], [0, 0, 1, 1], [], []>} : vector<8x128xbf16>, vector<128x128xbf16>, vector<8x128xf32> -> vector<8x128xf32>
    %c0_3 = arith.constant 0 : index
    %c0_4 = arith.constant 0 : index
    %3 = vector.load %arg2[%c0_3, %c0_4] : memref<8x128xbf16, #tpu.memory_space<vmem>>, vector<8x128xbf16>
    %c0_5 = arith.constant 0 : index
    %c0_6 = arith.constant 0 : index
    %4 = vector.load %arg4[%c0_5, %c0_6] : memref<128x128xbf16, #tpu.memory_space<vmem>>, vector<128x128xbf16>
    %cst_7 = arith.constant dense<0.000000e+00> : vector<8x128xf32>
    %5 = tpu.matmul %3, %4, %cst_7 {dimension_numbers = #tpu.dot_dimension_numbers<[1], [0], [0], [1], [0, 0, 1, 1], [], []>} : vector<8x128xbf16>, vector<128x128xbf16>, vector<8x128xf32> -> vector<8x128xf32>
    %6 = arith.mulf %2, %2 : vector<8x128xf32>
    %cst_8 = arith.constant dense<0.000000e+00> : vector<8xf32>
    %7 = vector.multi_reduction <add>, %6, %cst_8 [1] : vector<8x128xf32> to vector<8xf32>
    %8 = vector.shape_cast %7 : vector<8xf32> to vector<8x1xf32>
    %9 = math.rsqrt %8 : vector<8x1xf32>
    %10 = vector.broadcast %9 : vector<8x1xf32> to vector<8x128xf32>
    %11 = arith.mulf %2, %10 : vector<8x128xf32>
    %12 = arith.mulf %5, %5 : vector<8x128xf32>
    %cst_9 = arith.constant dense<0.000000e+00> : vector<8xf32>
    %13 = vector.multi_reduction <add>, %12, %cst_9 [1] : vector<8x128xf32> to vector<8xf32>
    %14 = vector.shape_cast %13 : vector<8xf32> to vector<8x1xf32>
    %15 = math.rsqrt %14 : vector<8x1xf32>
    %16 = vector.broadcast %15 : vector<8x1xf32> to vector<8x128xf32>
    %17 = arith.mulf %5, %16 : vector<8x128xf32>
    %c0_10 = arith.constant 0 : index
    %18 = memref.load %arg0[%c0_10] : memref<1xf32, #tpu.memory_space<smem>>
    %19 = vector.broadcast %18 : f32 to vector<8x128xf32>
    %20 = arith.mulf %11, %19 : vector<8x128xf32>
    %21 = arith.mulf %20, %17 : vector<8x128xf32>
    %cst_11 = arith.constant dense<0.000000e+00> : vector<8xf32>
    %22 = vector.multi_reduction <add>, %21, %cst_11 [1] : vector<8x128xf32> to vector<8xf32>
    %23 = vector.shape_cast %22 : vector<8xf32> to vector<8x1xf32>
    %24 = arith.truncf %20 : vector<8x128xf32> to vector<8x128xbf16>
    %25 = arith.truncf %17 : vector<8x128xf32> to vector<8x128xbf16>
    %cst_12 = arith.constant dense<0.000000e+00> : vector<8x8xf32>
    %26 = tpu.matmul %24, %25, %cst_12 {dimension_numbers = #tpu.dot_dimension_numbers<[1], [1], [0], [0], [0, 0, 1, 0], [], []>} : vector<8x128xbf16>, vector<8x128xbf16>, vector<8x8xf32> -> vector<8x8xf32>
    %27 = tpu.transpose %26, [1, 0] : vector<8x8xf32> -> vector<8x8xf32>
    %cst_13 = arith.constant dense<0xFF800000> : vector<8xf32>
    %28 = vector.multi_reduction <maximumf>, %26, %cst_13 [1] : vector<8x8xf32> to vector<8xf32>
    %29 = vector.shape_cast %28 : vector<8xf32> to vector<8x1xf32>
    %30 = vector.broadcast %29 : vector<8x1xf32> to vector<8x8xf32>
    %31 = arith.subf %26, %30 : vector<8x8xf32>
    %32 = math.exp %31 : vector<8x8xf32>
    %cst_14 = arith.constant dense<0.000000e+00> : vector<8xf32>
    %33 = vector.multi_reduction <add>, %32, %cst_14 [1] : vector<8x8xf32> to vector<8xf32>
    %34 = vector.shape_cast %33 : vector<8xf32> to vector<8x1xf32>
    %35 = math.log %34 : vector<8x1xf32>
    %36 = arith.addf %29, %35 : vector<8x1xf32>
    %37 = arith.subf %36, %23 : vector<8x1xf32>
    %38 = vector.shape_cast %37 : vector<8x1xf32> to vector<1x8x1xf32>
    %cst_15 = arith.constant dense<0.000000e+00> : vector<1xf32>
    %39 = vector.multi_reduction <add>, %38, %cst_15 [1, 2] : vector<1x8x1xf32> to vector<1xf32>
    %40 = vector.shape_cast %39 : vector<1xf32> to vector<1x1x1xf32>
    %41 = vector.extract %40[0, 0, 0] : f32 from vector<1x1x1xf32>
    %cst_16 = arith.constant 8.000000e+00 : f32
    %42 = arith.divf %41, %cst_16 : f32
    %cst_17 = arith.constant dense<0xFF800000> : vector<8xf32>
    %43 = vector.multi_reduction <maximumf>, %27, %cst_17 [1] : vector<8x8xf32> to vector<8xf32>
    %44 = vector.shape_cast %43 : vector<8xf32> to vector<8x1xf32>
    %45 = vector.broadcast %44 : vector<8x1xf32> to vector<8x8xf32>
    %46 = arith.subf %27, %45 : vector<8x8xf32>
    %47 = math.exp %46 : vector<8x8xf32>
    %cst_18 = arith.constant dense<0.000000e+00> : vector<8xf32>
    %48 = vector.multi_reduction <add>, %47, %cst_18 [1] : vector<8x8xf32> to vector<8xf32>
    %49 = vector.shape_cast %48 : vector<8xf32> to vector<8x1xf32>
    %50 = math.log %49 : vector<8x1xf32>
    %51 = arith.addf %44, %50 : vector<8x1xf32>
    %52 = arith.subf %51, %23 : vector<8x1xf32>
    %53 = vector.shape_cast %52 : vector<8x1xf32> to vector<1x8x1xf32>
    %cst_19 = arith.constant dense<0.000000e+00> : vector<1xf32>
    %54 = vector.multi_reduction <add>, %53, %cst_19 [1, 2] : vector<1x8x1xf32> to vector<1xf32>
    %55 = vector.shape_cast %54 : vector<1xf32> to vector<1x1x1xf32>
    %56 = vector.extract %55[0, 0, 0] : f32 from vector<1x1x1xf32>
    %cst_20 = arith.constant 8.000000e+00 : f32
    %57 = arith.divf %56, %cst_20 : f32
    %58 = arith.addf %42, %57 : f32
    %cst_21 = arith.constant 5.000000e-01 : f32
    %59 = arith.mulf %cst_21, %58 : f32
    %60 = vector.broadcast %59 : f32 to vector<1x1xf32>
    %c0_22 = arith.constant 0 : index
    %c0_23 = arith.constant 0 : index
    %61 = vector.load %arg5[%c0_22, %c0_23] : memref<1x1xf32, #tpu.memory_space<vmem>>, vector<1x1xf32>
    tpu.vector_store %arg5[%c0_22, %c0_23], %60 {strides = array<i32>} : memref<1x1xf32, #tpu.memory_space<vmem>>, vector<1x1xf32>,
    %c0_24 = arith.constant 0 : index
    %c0_25 = arith.constant 0 : index
    %62 = vector.load %arg6[%c0_24, %c0_25] : memref<8x8xf32, #tpu.memory_space<vmem>>, vector<8x8xf32>
    tpu.vector_store %arg6[%c0_24, %c0_25], %26 {strides = array<i32>} : memref<8x8xf32, #tpu.memory_space<vmem>>, vector<8x8xf32>,
    return
  }
}

</mosaic_0001>

<bundles_post_ra>
// kernel: tpu_custom_call.1
= control target key start
LH: loop header
LB: loop body
LE: loop exit
PB: predicated region body
PF: predicated region fallthrough
CT: control target
= control target key end

     0   :  { %13 = vsyncpa [#allocation4], 0  ;;  %s820_s0 = inlined_call_operand.<no memory space> [shape: f32[1], index: 0, kind: input, shape index: {}]   ;;  %s821_s1 = inlined_call_operand.hbm [shape: bf16[8,128], index: 1, kind: input, shape index: {}]   ;;  %s822_s2 = inlined_call_operand.vmem [shape: bf16[8,128], index: 2, kind: input, shape index: {}]   ;;  %s823_s3 = inlined_call_operand.hbm [shape: bf16[128,128], index: 3, kind: input, shape index: {}]   ;;  %s824_s4 = inlined_call_operand.hbm [shape: bf16[128,128], index: 4, kind: input, shape index: {}]   ;;  %s825_s5 = inlined_call_operand.hbm [shape: f32[1,1], index: 5, kind: output, shape index: {0}]   ;;  %s826_s6 = inlined_call_operand.hbm [shape: f32[8,8], index: 6, kind: output, shape index: {1}]  }
   0x1   :  { %14 = vsyncpa [#allocation7], 0 }
   0x2   :  { %15 = vsyncpa [#allocation5], 0 }
   0x3   :  { %16 = vsyncpa [#allocation11], 0  ;;  %s696_s21 = smov [#allocation6]   ;;  %s578_s25 = scalar_lea.hbm %s823_s3, 1024 }
   0x4   :  { %s36_s22 = sshll.u32 %s696_s21, 4  ;;  %p579_p0 = scmp.ne.s32.totalorder %s823_s3, %s578_s25  ;;  %s37_s22 = int_to_ptr.vmem [resolvable:$true] %s36_s22 }
   0x5   :  { %p582_p1 = scmp.lt.u32.totalorder %s578_s25, %s823_s3 }
   0x7   :  { %p584_p2 = pnand %p582_p1, %p579_p0 }
   0x9   :  { %587 = shalt.err (!%p584_p2)
}
   0xa   :  { %s588_s30 = scalar_lea.vmem %s37_s22, 1024  ;;  %p593_p4 = scmp.lt.s32.totalorder %s37_s22, %s37_s22 }
   0xb   :  { %p589_p3 = scmp.ne.s32.totalorder %s37_s22, %s588_s30  ;;  %p594_p5 = scmp.lt.s32.totalorder %s588_s30, %s588_s30 }
   0xd   :  { %p595_p6 = por %p594_p5, %p593_p4 }
   0xf   :  { %p596_p7 = pnand %p595_p6, %p589_p3 }
  0x11   :  { %599 = shalt.err (!%p596_p7)
}
  0x12   :  { %s697_s7 = smov 64   ;;  %s698_s8 = smov 4  }
  0x13   :  { %42 = dma.hbm_to_vmem [thread:$0]  %s823_s3, 1024, %s37_s22, [#allocation7], %s697_s7, %s697_s7, %s698_s8  }
  0x14   :  { %s699_s11 = smov [#allocation3]   ;;  %s700_s13 = smov [#allocation8]  }
  0x15   :  { %s25_s12 = sshll.u32 %s699_s11, 4  ;;  %s48_s14 = sshll.u32 %s700_s13, 4  ;;  %s26_s12 = int_to_ptr.vmem [resolvable:$true] %s25_s12  ;;  %s49_s14 = int_to_ptr.vmem [resolvable:$true] %s48_s14 }
  0x16   :  { %s600_s17 = scalar_lea.hbm %s821_s1, 64 }
  0x17   :  { %p601_p8 = scmp.ne.s32.totalorder %s821_s1, %s600_s17  ;;  %p604_p9 = scmp.lt.u32.totalorder %s600_s17, %s821_s1 }
  0x19   :  { %p606_p10 = pnand %p604_p9, %p601_p8 }
  0x1b   :  { %609 = shalt.err (!%p606_p10)
}
  0x1c   :  { %s610_s3 = scalar_lea.vmem %s26_s12, 64  ;;  %p615_p12 = scmp.lt.s32.totalorder %s26_s12, %s26_s12 }
  0x1d   :  { %p611_p11 = scmp.ne.s32.totalorder %s26_s12, %s610_s3  ;;  %p616_p13 = scmp.lt.s32.totalorder %s610_s3, %s610_s3 }
  0x1f   :  { %p617_p0 = por %p616_p13, %p615_p12 }
  0x21   :  { %p618_p1 = pnand %p617_p0, %p611_p11 }
  0x23   :  { %621 = shalt.err (!%p618_p1)
}
  0x24   :  { %28 = dma.hbm_to_vmem [thread:$0]  %s821_s1, 64, %s26_s12, [#allocation4]  }
  0x25   :  { %s622_s26 = scalar_lea.hbm %s824_s4, 1024 }
  0x26   :  { %p623_p2 = scmp.ne.s32.totalorder %s824_s4, %s622_s26  ;;  %p626_p3 = scmp.lt.u32.totalorder %s622_s26, %s824_s4 }
  0x28   :  { %p628_p4 = pnand %p626_p3, %p623_p2 }
  0x2a   :  { %631 = shalt.err (!%p628_p4)
}
  0x2b   :  { %s632_s9 = scalar_lea.vmem %s49_s14, 1024  ;;  %p637_p6 = scmp.lt.s32.totalorder %s49_s14, %s49_s14 }
  0x2c   :  { %p633_p5 = scmp.ne.s32.totalorder %s49_s14, %s632_s9  ;;  %p638_p7 = scmp.lt.s32.totalorder %s632_s9, %s632_s9 }
  0x2e   :  { %p639_p8 = por %p638_p7, %p637_p6 }
  0x30   :  { %p640_p9 = pnand %p639_p8, %p633_p5 }
  0x32   :  { %643 = shalt.err (!%p640_p9)
}
  0x33   :  { %54 = dma.hbm_to_vmem [thread:$0]  %s824_s4, 1024, %s49_s14, [#allocation7], %s697_s7, %s697_s7, %s698_s8  }
  0x34   :  { %688 = dma.done.wait [#allocation4], 64  }
  0x35   :  { %689 = vsyncadd [#allocation4], 4294967232 }
  0x36   :  { %690 = dma.done.wait [#allocation7], 2048  }
  0x37   :  { %691 = vsyncadd [#allocation7], 4294965248  ;;  %v701_v0 = vmov 0.0   ;;  %vm702_vm0 = vmmov 0   ;;  %v550_v1 = vld [vmem:[#allocation8] sm:$0xff]   ;;  %v552_v3 = vld [vmem:[#allocation8 + $0x8] sm:$0xff]   ;;  %v286_v35 = vstv %s820_s0 }
  0x38   :  { %511 = vmatprep.subr.bf16.mxu1 %v701_v0  ;;  %491 = vmatprep.subr.bf16.mxu0 %v701_v0  ;;  %v551_v2 = vld [vmem:[#allocation6] sm:$0xff]   ;;  %v553_v4 = vld [vmem:[#allocation6 + $0x8] sm:$0xff]   ;;  %v554_v5 = vld [vmem:[#allocation8 + $0x10] sm:$0xff]   ;;  %vm365_vm1 = vcmask 64512   ;;  %vm379_vm2 = vcmask 7168   ;;  %s703_s0 = smov [#allocation10]  }
  0x39   :  { %527 = vmatprep.mubr.msk.bf16.mxu1 %vm702_vm0, %v701_v0  ;;  %507 = vmatprep.mubr.msk.bf16.mxu0 %vm702_vm0, %v701_v0  ;;  %v555_v6 = vld [vmem:[#allocation6 + $0x10] sm:$0xff]   ;;  %v556_v7 = vld [vmem:[#allocation8 + $0x18] sm:$0xff]   ;;  %v558_v9 = vld [vmem:[#allocation8 + $0x20] sm:$0xff]   ;;  %s441_s11 = sshll.u32 %s703_s0, 4  ;;  %s442_s11 = int_to_ptr.vmem [resolvable:$true] %s441_s11 }
  0x3a   :  { %512 = vmatpush3.bf16.msra.mxu1 %v550_v1  ;;  %492 = vmatpush3.bf16.msra.mxu0 %v551_v2  ;;  %v557_v8 = vld [vmem:[#allocation6 + $0x18] sm:$0xff]   ;;  %v559_v10 = vld [vmem:[#allocation6 + $0x20] sm:$0xff]   ;;  %v560_v11 = vld [vmem:[#allocation8 + $0x28] sm:$0xff]   ;;  %s644_s12 = scalar_lea.vmem %s442_s11, 128  ;;  %p649_p11 = scmp.lt.s32.totalorder %s442_s11, %s442_s11 }
  0x3b   :  { %513 = vmatprep.subr.bf16.mxu1 %v701_v0  ;;  %493 = vmatprep.subr.bf16.mxu0 %v701_v0  ;;  %v561_v12 = vld [vmem:[#allocation6 + $0x28] sm:$0xff]   ;;  %v562_v13 = vld [vmem:[#allocation8 + $0x30] sm:$0xff]   ;;  %v564_v15 = vld [vmem:[#allocation8 + $0x38] sm:$0xff]   ;;  %p645_p10 = scmp.ne.s32.totalorder %s442_s11, %s644_s12  ;;  %p650_p12 = scmp.lt.s32.totalorder %s644_s12, %s644_s12 }
  0x3c   :  { %v563_v14 = vld [vmem:[#allocation6 + $0x30] sm:$0xff]   ;;  %v565_v16 = vld [vmem:[#allocation6 + $0x38] sm:$0xff]  }
  0x3d   :  { %v170_v17 = vld [vmem:[%s822_s2] sm:$0xf]  ;;  %p651_p13 = por %p650_p12, %p649_p11 }
  0x3e   :  { %514 = vmatpush3.bf16.msra.mxu1 %v552_v3  ;;  %494 = vmatpush3.bf16.msra.mxu0 %v553_v4  ;;  %v65_v18 = vld [vmem:[#allocation3] sm:$0xf] }
  0x3f   :  { %515 = vmatprep.subr.bf16.mxu1 %v701_v0  ;;  %495 = vmatprep.subr.bf16.mxu0 %v701_v0  ;;  %p652_p0 = pnand %p651_p13, %p645_p10 }
  0x42   :  { %516 = vmatpush3.bf16.msra.mxu1 %v554_v5  ;;  %496 = vmatpush3.bf16.msra.mxu0 %v555_v6 }
  0x43   :  { %517 = vmatprep.subr.bf16.mxu1 %v701_v0  ;;  %497 = vmatprep.subr.bf16.mxu0 %v701_v0 }
  0x46   :  { %518 = vmatpush3.bf16.msra.mxu1 %v556_v7  ;;  %498 = vmatpush3.bf16.msra.mxu0 %v557_v8 }
  0x47   :  { %519 = vmatprep.subr.bf16.mxu1 %v701_v0  ;;  %499 = vmatprep.subr.bf16.mxu0 %v701_v0 }
  0x4a   :  { %520 = vmatpush3.bf16.msra.mxu1 %v558_v9  ;;  %500 = vmatpush3.bf16.msra.mxu0 %v559_v10 }
  0x4b   :  { %521 = vmatprep.subr.bf16.mxu1 %v701_v0  ;;  %501 = vmatprep.subr.bf16.mxu0 %v701_v0 }
  0x4e   :  { %522 = vmatpush3.bf16.msra.mxu1 %v560_v11  ;;  %502 = vmatpush3.bf16.msra.mxu0 %v561_v12 }
  0x4f   :  { %523 = vmatprep.subr.bf16.mxu1 %v701_v0  ;;  %503 = vmatprep.subr.bf16.mxu0 %v701_v0 }
  0x52   :  { %524 = vmatpush3.bf16.msra.mxu1 %v562_v13  ;;  %504 = vmatpush3.bf16.msra.mxu0 %v563_v14 }
  0x53   :  { %525 = vmatprep.subr.bf16.mxu1 %v701_v0  ;;  %505 = vmatprep.subr.bf16.mxu0 %v701_v0 }
  0x56   :  { %526 = vmatpush3.bf16.msra.mxu1 %v564_v15  ;;  %506 = vmatpush3.bf16.msra.mxu0 %v565_v16 }
  0x57   :  { %531 = vmatprep.subr.bf16.mxu0 %v701_v0 }
  0x59   :  { %528 = vmatmul.mubr.bf16.vlgmr.msra.gmra.mrb[0].mxu1 %v170_v17  ;;  %508 = vmatmul.mubr.bf16.vlgmr.msra.gmra.mrb[0].mxu0 %v65_v18 }
  0x5a   :  { %533 = vmatprep.mubr.msk.bf16.mxu0 %vm702_vm0, %v701_v0 }
 0x12c   :  { %v269_v19 = vpop.f32.mrb[0].mxu1  ;;  %v164_v22 = vpop.f32.mrb[0].mxu0 }
 0x12d   :  { %v529_v20 = vpop.f32.mrb[1].mxu1  ;;  %v280_v21 = vmul.f32 %v269_v19, %v269_v19  ;;  %v509_v24 = vpop.f32.mrb[1].mxu0  ;;  %v275_v27 = vmul.f32 %v164_v22, %v164_v22 }
 0x12e   :  { %v272_v23 = vpop.f32.mrb[2].mxu1  ;;  %v167_v26 = vpop.f32.mrb[2].mxu0 }
 0x12f   :  { %281 = vadd.xlane.f32.xlu0 %v280_v21  ;;  %v530_v25 = vpop.f32.mrb[3].mxu1  ;;  %v510_v28 = vpop.f32.mrb[3].mxu0 }
 0x133   :  { %276 = vadd.xlane.f32.xlu0 %v275_v27 }
 0x1bc   :  { %v282_v29 = vpop.xlane.xlu0 %281 }
 0x1bd   :  { %566 = vrsqrt.f32 %v282_v29 }
 0x1c0   :  { %v277_v30 = vpop.xlane.xlu0 %276 }
 0x1c1   :  { %568 = vrsqrt.f32 %v277_v30 }
 0x1c7   :  { %v567_v31 = vpop.eup %566 }
 0x1c8   :  { %v284_v32 = vmul.f32 %v567_v31, %v269_v19 }
 0x1ca   :  { %v292_v33 = vpack.c.bf16 %v284_v32, %v284_v32 }
 0x1cb   :  { %v569_v34 = vpop.eup %568 }
 0x1cc   :  { %532 = vmatpush3.bf16.xpose.msra.mxu0 %v292_v33  ;;  %v279_v36 = vmul.f32 %v569_v34, %v164_v22 }
 0x1ce   :  { %v287_v37 = vmul.f32 %v286_v35, %v279_v36 }
 0x1d0   :  { %v291_v38 = vpack.c.bf16 %v287_v37, %v287_v37  ;;  %v288_v39 = vmul.f32 %v287_v37, %v284_v32 }
 0x1d3   :  { %534 = vmatmul.mubr.bf16.vlgmr.msra.gmra.mrb[4].mxu0 %v291_v38 }
 0x2a6   :  { %v327_v40 = vpop.f32.mrb[4].mxu0 }
 0x2a7   :  { %333 = vxpose.xlu1.b32.start.end [1/1] (short) (narrow) %v327_v40, 8  ;;  %v535_v41 = vpop.f32.mrb[5].mxu0  ;;  %424 = vst.msk [vmem:[#allocation10] sm:$0xff] %vm365_vm1, %v327_v40  ;;  %v366_v44 = vsel %vm365_vm1, %v327_v40, -inf }
 0x2a8   :  { %v330_v42 = vpop.f32.mrb[6].mxu0 }
 0x2a9   :  { %v536_v43 = vpop.f32.mrb[7].mxu0 }
 0x2ce   :  { %367 = vmax.xlane.f32.xlu1 %v366_v44 }
 0x327   :  { %v349_v45 = vpop.trf.xlu1 }
 0x328   :  { %v393_v46 = vsel %vm365_vm1, %v349_v45, -inf }
 0x329   :  { %394 = vmax.xlane.f32.xlu0 %v393_v46 }
 0x35b   :  { %v368_v47 = vpop.xlane.xlu1 %367 }
 0x35c   :  { %v369_v48 = vsub.f32 %v327_v40, %v368_v47 }
 0x35e   :  { %v370_v49 = vmul.f32 1.442695, %v369_v48 }
 0x360   :  { %570 = vpow2.f32 %v370_v49 }
 0x36a   :  { %v571_v50 = vpop.eup %570 }
 0x36b   :  { %v372_v51 = vsel %vm365_vm1, %v571_v50, 0.0 }
 0x36c   :  { %373 = vadd.xlane.f32.xlu0 %v372_v51 }
 0x3b6   :  { %v395_v52 = vpop.xlane.xlu0 %394 }
 0x3b7   :  { %v396_v53 = vsub.f32 %v349_v45, %v395_v52 }
 0x3b9   :  { %v397_v54 = vmul.f32 1.442695, %v396_v53 }
 0x3bb   :  { %572 = vpow2.f32 %v397_v54 }
 0x3c5   :  { %v573_v55 = vpop.eup %572 }
 0x3c6   :  { %v399_v56 = vsel %vm365_vm1, %v573_v55, 0.0 }
 0x3c7   :  { %400 = vadd.xlane.f32.xlu0 %v399_v56 }
 0x3cb   :  { %289 = vadd.xlane.f32.xlu0 %v288_v39 }
 0x3f9   :  { %v374_v57 = vpop.xlane.xlu0 %373 }
 0x3fa   :  { %574 = vlog2.f32 %v374_v57 }
 0x404   :  { %v575_v58 = vpop.eup %574 }
 0x405   :  { %v376_v59 = vmul.f32 0.6931472, %v575_v58 }
 0x407   :  { %v377_v61 = vadd.f32 %v376_v59, %v368_v47 }
 0x454   :  { %v401_v60 = vpop.xlane.xlu0 %400 }
 0x455   :  { %576 = vlog2.f32 %v401_v60 }
 0x458   :  { %v290_v62 = vpop.xlane.xlu0 %289 }
 0x459   :  { %v378_v63 = vsub.f32 %v377_v61, %v290_v62 }
 0x45b   :  { %v380_v0 = vsel %vm379_vm2, %v378_v63, 0.0 }
 0x45c   :  { %381 = vadd.xlane.f32.xlu0 %v380_v0 }
 0x45f   :  { %v577_v1 = vpop.eup %576 }
 0x460   :  { %v403_v2 = vmul.f32 0.6931472, %v577_v1 }
 0x462   :  { %v404_v3 = vadd.f32 %v403_v2, %v395_v52 }
 0x464   :  { %v405_v4 = vsub.f32 %v404_v3, %v290_v62 }
 0x466   :  { %v406_v5 = vsel %vm379_vm2, %v405_v4, 0.0 }
 0x467   :  { %407 = vadd.xlane.f32.xlu0 %v406_v5 }
 0x468   :  { %655 = shalt.err (!%p652_p0)
}
 0x469   :  { %s656_s15 = scalar_lea.hbm %s826_s6, 128 }
 0x46a   :  { %p657_p1 = scmp.ne.s32.totalorder %s826_s6, %s656_s15  ;;  %p660_p2 = scmp.lt.u32.totalorder %s656_s15, %s826_s6 }
 0x46c   :  { %p662_p3 = pnand %p660_p2, %p657_p1 }
 0x46e   :  { %665 = shalt.err (!%p662_p3)
}
 0x46f   :  { %444 = dma.vmem_to_hbm [thread:$0]  %s442_s11, 128, %s826_s6, [#allocation11]   ;;  %vm422_vm3 = vcmask 0  }
 0x470   :  { %s704_s25 = smov [#allocation9]  }
 0x471   :  { %s431_s26 = sshll.u32 %s704_s25, 4  ;;  %s432_s26 = int_to_ptr.vmem [resolvable:$true] %s431_s26 }
 0x472   :  { %s666_s28 = scalar_lea.vmem %s432_s26, 16  ;;  %s670_s29 = scalar_lea.vmem %s432_s26, 32 }
 0x473   :  { %p667_p4 = scmp.ne.s32.totalorder %s432_s26, %s666_s28  ;;  %p671_p5 = scmp.lt.s32.totalorder %s432_s26, %s432_s26 }
 0x474   :  { %p672_p6 = scmp.lt.s32.totalorder %s670_s29, %s666_s28 }
 0x476   :  { %p673_p7 = por %p672_p6, %p671_p5 }
 0x478   :  { %p674_p8 = pnand %p673_p7, %p667_p4 }
 0x4e9   :  { %v382_v6 = vpop.xlane.xlu0 %381 }
 0x4ea   :  { %v383_v7 = vrot.slane %v382_v6, 4 }
 0x4ec   :  { %v384_v8 = vadd.f32 %v383_v7, %v382_v6 }
 0x4ee   :  { %v385_v9 = vrot.slane %v384_v8, 2 }
 0x4f0   :  { %v386_v10 = vadd.f32 %v385_v9, %v384_v8 }
 0x4f2   :  { %v387_v11 = vrot.slane %v386_v10, 1 }
 0x4f4   :  { %v408_v12 = vpop.xlane.xlu0 %407  ;;  %v388_v13 = vadd.f32 %v387_v11, %v386_v10 }
 0x4f5   :  { %v409_v14 = vrot.slane %v408_v12, 4 }
 0x4f6   :  { %537 = vpush %v388_v13 }
 0x4f7   :  { %v410_v15 = vadd.f32 %v409_v14, %v408_v12 }
 0x4f9   :  { %v411_v16 = vrot.slane %v410_v15, 2 }
 0x4fb   :  { %v412_v17 = vadd.f32 %v411_v16, %v410_v15 }
 0x4fd   :  { %v413_v18 = vrot.slane %v412_v17, 1 }
 0x4ff   :  { %v414_v19 = vadd.f32 %v413_v18, %v412_v17 }
 0x501   :  { %539 = vpush %v414_v19 }
 0x527   :  { %s538_s3 = spop %537 }
 0x528   :  { %s392_s22 = smul.f32 0.125, %s538_s3 }
 0x532   :  { %s540_s23 = spop %539 }
 0x533   :  { %s418_s6 = smul.f32 0.125, %s540_s23 }
 0x535   :  { %s419_s24 = sadd.f32 %s418_s6, %s392_s22 }
 0x537   :  { %s420_s27 = smul.f32 0.5, %s419_s24 }
 0x539   :  { %v421_v20 = vstv %s420_s27 }
 0x53a   :  { %423 = vst.msk [vmem:[#allocation9] sm:$0x1] %vm422_vm3, %v421_v20 }
 0x53b   :  { %677 = shalt.err (!%p674_p8)
}
 0x53c   :  { %s678_s1 = scalar_lea.hbm %s825_s5, 16 }
 0x53d   :  { %p679_p9 = scmp.ne.s32.totalorder %s825_s5, %s678_s1  ;;  %p682_p10 = scmp.lt.u32.totalorder %s678_s1, %s825_s5 }
 0x53f   :  { %p684_p11 = pnand %p682_p10, %p679_p9 }
 0x541   :  { %687 = shalt.err (!%p684_p11)
}
 0x542   :  { %434 = dma.vmem_to_hbm [thread:$0]  %s432_s26, 16, %s825_s5, [#allocation5]  }
 0x543   :  { %692 = dma.done.wait [#allocation5], 16  }
 0x544   :  { %693 = vsyncadd [#allocation5], 4294967280 }
 0x545   :  { %694 = dma.done.wait [#allocation11], 128  }
 0x546   :  { %695 = vsyncadd [#allocation11], 4294967168 }
 0x547   :  { %451 = vsyncpa [#allocation4], 1 }
 0x548   :  { %452 = vsyncpa [#allocation7], 1 }
 0x549   :  { %453 = vsyncpa [#allocation5], 1 }
 0x54a   :  { %454 = vsyncpa [#allocation11], 1 }

</bundles_post_ra>
